<compile_context>
chip_gen: v5e
topology: v5e:2x2
jax: 0.10.0
libtpu: 0.0.40
codegen_flags: <defaults>
</compile_context>

<pallas_src>
import jax
import jax.numpy as jnp
from jax.experimental import pallas as pl
from jax.experimental.pallas import tpu as pltpu


def _round_up(x: int, m: int) -> int:
    return (x + m - 1) // m * m


def _vmem_capacity_bytes() -> int:
    try:
        return int(pltpu.get_tpu_info().vmem_capacity_bytes)
    except Exception:
        return 64 << 20  # conservative: v7x per-TensorCore capacity


def mlp_kernel(x_ref, w1_ref, b1_ref, w2_ref, b2_ref, o_ref):
    # Streamed activation tile: f32 in HBM/VMEM, cast to bf16 on the VPU just
    # before the MXU (hidden under the matmul).  Weight casts are no-ops when
    # params were prepared with prepare_params() (already bf16).
    x = x_ref[...].astype(jnp.bfloat16)
    w1 = w1_ref[...].astype(jnp.bfloat16)
    w2 = w2_ref[...].astype(jnp.bfloat16)

    # fc1 on the MXU, f32 accumulation; bias add + ReLU in f32 on the VPU
    # (b1 is (1, H) -> clean lane broadcast).
    h = jnp.dot(x, w1, preferred_element_type=jnp.float32)
    h = jnp.maximum(h + b1_ref[...], 0.0)

    # fc2: activations back to bf16 for the MXU, accumulate in f32.
    out = jnp.dot(h.astype(jnp.bfloat16), w2, preferred_element_type=jnp.float32)
    o_ref[...] = (out + b2_ref[...]).astype(o_ref.dtype)


def prepare_params(w1, b1, w2, b2):
    """One-time parameter prep.  Cache the result across forward calls.

    Weights -> bf16 (MXU-native operands; f32 accumulation happens in-kernel),
    biases stay f32 and are reshaped to (1, N) for lane broadcast.
    w1: (In, H), w2: (H, Out)  (transposed vs. PyTorch fc*.weight).
    """
    In, H = w1.shape
    H2, Out = w2.shape
    assert H == H2
    return (w1.astype(jnp.bfloat16),
            jnp.reshape(b1, (1, H)).astype(jnp.float32),
            w2.astype(jnp.bfloat16),
            jnp.reshape(b2, (1, Out)).astype(jnp.float32))


def simple_feedforward_nn(x, w1, b1, w2, b2, *, block_m=None):
    """Pallas forward of SimpleFeedForwardNN.

    x : (B, In) f32
    w1: (In, H)  bf16 (preferred, via prepare_params) or f32
    b1: (H,) or (1, H) f32
    w2: (H, Out) bf16 (preferred) or f32
    b2: (Out,) or (1, Out) f32
    returns (B, Out) f32
    """
    B, In = x.shape
    In_w, H = w1.shape
    H_w, Out = w2.shape
    assert In == In_w and H == H_w

    # Biases: make (1, N) f32 (no-op when prepare_params was used).
    if b1.ndim == 1:
        b1 = jnp.reshape(b1, (1, H))
    if b2.ndim == 1:
        b2 = jnp.reshape(b2, (1, Out))
    b1 = b1.astype(jnp.float32)
    b2 = b2.astype(jnp.float32)

    vmem_cap = _vmem_capacity_bytes()
    vmem_budget = int(0.8 * vmem_cap)

    if block_m is None:
        # 128-MiB-VMEM parts (v5e/v6e) benefit from larger streamed tiles;
        # keep 512 on v7x (64 MiB/TC).
        block_m = 1024 if vmem_cap >= (96 << 20) else 512

    # >= 2 grid steps when B allows it so the "parallel" batch axis shards
    # across both v7x TensorCores; tile rows are always a multiple of 8.
    tm = max(8, min(block_m, _round_up(pl.cdiv(B, 2), 8), _round_up(B, 8)))

    w_elt = jnp.dtype(w1.dtype).itemsize  # 2 if prepared (bf16), 4 if raw f32

    def vmem_needed(tm_eff: int, n_wbuf: int) -> int:
        weight_bytes = n_wbuf * ((In * H + H * Out) * w_elt + (H + Out) * 4)
        stream_bytes = 2 * (tm_eff * In * 4 + tm_eff * Out * 4)  # 2x-buffered x/out
        # In-kernel temporaries: bf16 copy of x, h (f32) + bf16 copy, out f32.
        interm_bytes = tm_eff * In * 2 + tm_eff * H * (4 + 2) + tm_eff * Out * 4
        return weight_bytes + stream_bytes + interm_bytes + (2 << 20)  # slack

    if vmem_needed(8, 1) > vmem_budget:
        # TODO(synk): add a K/N-tiled fallback (extra "arbitrary" grid axes +
        # f32 VMEM accumulator) for weights too large to stay VMEM-resident
        # (relevant on v7x's 64 MiB/TC for ~4K-wide layers).
        raise NotImplementedError(
            "weights do not fit VMEM-resident on this TPU generation")

    flops = 2 * B * (In * H + H * Out)
    bytes_accessed = int(x.size * 4 + (In * H + H * Out) * w_elt
                         + (H + Out) * 4 + B * Out * 4)

    def _attempt(single_buffer_weights: bool):
        n_wbuf = 1 if single_buffer_weights else 2
        tm_eff = tm
        while tm_eff > 8 and vmem_needed(tm_eff, n_wbuf) > vmem_budget:
            tm_eff = max(8, _round_up(tm_eff // 2, 8))
        vmem_limit = int(min(max(vmem_needed(tm_eff, n_wbuf), 4 << 20),
                             vmem_budget))

        def resident(shape):
            # Constant index_map blocks never change across the grid;
            # double-buffering them is pure VMEM waste.
            if single_buffer_weights:
                return pl.BlockSpec(shape, lambda i: (0,) * len(shape),
                                    pipeline_mode=pl.Buffered(1))
            return pl.BlockSpec(shape, lambda i: (0,) * len(shape))

        return pl.pallas_call(
            mlp_kernel,
            out_shape=jax.ShapeDtypeStruct((B, Out), jnp.float32),
            grid=(pl.cdiv(B, tm_eff),),
            in_specs=[
                pl.BlockSpec((tm_eff, In), lambda i: (i, 0)),  # streamed x (f32)
                resident((In, H)),                              # resident weights
                resident((1, H)),
                resident((H, Out)),
                resident((1, Out)),
            ],
            out_specs=pl.BlockSpec((tm_eff, Out), lambda i: (i, 0)),
            compiler_params=pltpu.CompilerParams(
                dimension_semantics=("parallel",),
                vmem_limit_bytes=vmem_limit,
            ),
            cost_estimate=pl.CostEstimate(
                flops=flops, bytes_accessed=bytes_accessed, transcendentals=0),
        )(x, w1, b1, w2, b2)

    try:
        return _attempt(single_buffer_weights=True)
    except NotImplementedError:
        raise
    except Exception:
        # pipeline_mode / Buffered(1) not accepted by this JAX/Mosaic version:
        # fall back to default (double-buffered) resident operands.
        return _attempt(single_buffer_weights=False)


def _torch_linear_init(key, fan_in, fan_out):
    """Deterministic init mimicking nn.Linear default (uniform +/- 1/sqrt(fan_in))."""
    kw, kb = jax.random.split(key)
    bound = 1.0 / jnp.sqrt(fan_in)
    w = jax.random.uniform(kw, (fan_in, fan_out), jnp.float32, -bound, bound)
    b = jax.random.uniform(kb, (fan_out,), jnp.float32, -bound, bound)
    return w, b


if __name__ == "__main__":
    input_size, hidden_size, output_size = 16, 32, 8
    batch = 8

    key = jax.random.PRNGKey(0)
    kx, k1, k2 = jax.random.split(key, 3)

    x = jax.random.normal(kx, (batch, input_size), jnp.float32)
    w1, b1 = _torch_linear_init(k1, input_size, hidden_size)
    w2, b2 = _torch_linear_init(k2, hidden_size, output_size)

    # One-time parameter prep (bf16 weights, (1, N) biases) -- cacheable.
    params = prepare_params(w1, b1, w2, b2)

    out = simple_feedforward_nn(x, *params)
    out = jax.block_until_ready(out)
    assert out.shape == (batch, output_size)

    # Reference 1: same bf16-operand / f32-accumulate recipe in pure JAX (tight).
    x_bf, w1_bf, w2_bf = (a.astype(jnp.bfloat16) for a in (x, w1, w2))
    h_ref = jnp.maximum(
        jnp.dot(x_bf, w1_bf, preferred_element_type=jnp.float32)
        + b1.reshape(1, -1), 0.0)
    ref_bf = (jnp.dot(h_ref.astype(jnp.bfloat16), w2_bf,
                      preferred_element_type=jnp.float32) + b2.reshape(1, -1))
    assert jnp.allclose(out, ref_bf, atol=1e-3, rtol=1e-3)

    # Reference 2: full-f32 math (loose; bounds the bf16 quantization error).
    ref_f32 = jnp.maximum(x @ w1 + b1.reshape(1, -1), 0.0) @ w2 + b2.reshape(1, -1)
    assert jnp.allclose(out, ref_f32, atol=5e-2, rtol=5e-2)

    print("KERNEL_OK")
</pallas_src>

<mosaic_0001>
module attributes {stable_mosaic.version = 11 : i64} {
  func.func @mlp_kernel(%arg0: i32, %arg1: memref<8x16xf32, #tpu.memory_space<vmem>>, %arg2: memref<16x32xbf16, #tpu.memory_space<vmem>>, %arg3: memref<1x32xf32, #tpu.memory_space<vmem>>, %arg4: memref<32x8xbf16, #tpu.memory_space<vmem>>, %arg5: memref<1x8xf32, #tpu.memory_space<vmem>>, %arg6: memref<8x8xf32, #tpu.memory_space<vmem>>) attributes {dimension_semantics = [#tpu.dimension_semantics<parallel>], iteration_bounds = array<i64: 1>, scalar_prefetch = 0 : i64, scratch_operands = 0 : i64, tpu.core_type = #tpu.core_type<tc>, window_params = [{transform_indices = @transform_0, window_bounds = array<i64: 8, 16>}, {pipeline_mode = #tpu.pipeline_mode<synchronous>, transform_indices = @transform_1, window_bounds = array<i64: 16, 32>}, {pipeline_mode = #tpu.pipeline_mode<synchronous>, transform_indices = @transform_2, window_bounds = array<i64: 1, 32>}, {pipeline_mode = #tpu.pipeline_mode<synchronous>, transform_indices = @transform_3, window_bounds = array<i64: 32, 8>}, {pipeline_mode = #tpu.pipeline_mode<synchronous>, transform_indices = @transform_4, window_bounds = array<i64: 1, 8>}, {transform_indices = @transform_5, window_bounds = array<i64: 8, 8>}]} {
    %c0 = arith.constant 0 : index
    %c0_0 = arith.constant 0 : index
    %0 = vector.load %arg1[%c0, %c0_0] : memref<8x16xf32, #tpu.memory_space<vmem>>, vector<8x16xf32>
    %1 = arith.truncf %0 : vector<8x16xf32> to vector<8x16xbf16>
    %c0_1 = arith.constant 0 : index
    %c0_2 = arith.constant 0 : index
    %2 = vector.load %arg2[%c0_1, %c0_2] : memref<16x32xbf16, #tpu.memory_space<vmem>>, vector<16x32xbf16>
    %c0_3 = arith.constant 0 : index
    %c0_4 = arith.constant 0 : index
    %3 = vector.load %arg4[%c0_3, %c0_4] : memref<32x8xbf16, #tpu.memory_space<vmem>>, vector<32x8xbf16>
    %cst = arith.constant dense<0.000000e+00> : vector<8x32xf32>
    %4 = tpu.matmul %1, %2, %cst {dimension_numbers = #tpu.dot_dimension_numbers<[1], [0], [0], [1], [0, 0, 1, 1], [], []>} : vector<8x16xbf16>, vector<16x32xbf16>, vector<8x32xf32> -> vector<8x32xf32>
    %c0_5 = arith.constant 0 : index
    %c0_6 = arith.constant 0 : index
    %5 = vector.load %arg3[%c0_5, %c0_6] : memref<1x32xf32, #tpu.memory_space<vmem>>, vector<1x32xf32>
    %6 = vector.broadcast %5 : vector<1x32xf32> to vector<8x32xf32>
    %7 = arith.addf %4, %6 : vector<8x32xf32>
    %cst_7 = arith.constant 0.000000e+00 : f32
    %8 = vector.broadcast %cst_7 : f32 to vector<8x32xf32>
    %9 = arith.maximumf %7, %8 : vector<8x32xf32>
    %10 = arith.truncf %9 : vector<8x32xf32> to vector<8x32xbf16>
    %cst_8 = arith.constant dense<0.000000e+00> : vector<8x8xf32>
    %11 = tpu.matmul %10, %3, %cst_8 {dimension_numbers = #tpu.dot_dimension_numbers<[1], [0], [0], [1], [0, 0, 1, 1], [], []>} : vector<8x32xbf16>, vector<32x8xbf16>, vector<8x8xf32> -> vector<8x8xf32>
    %c0_9 = arith.constant 0 : index
    %c0_10 = arith.constant 0 : index
    %12 = vector.load %arg5[%c0_9, %c0_10] : memref<1x8xf32, #tpu.memory_space<vmem>>, vector<1x8xf32>
    %13 = vector.broadcast %12 : vector<1x8xf32> to vector<8x8xf32>
    %14 = arith.addf %11, %13 : vector<8x8xf32>
    %c0_11 = arith.constant 0 : index
    %c0_12 = arith.constant 0 : index
    %15 = vector.load %arg6[%c0_11, %c0_12] : memref<8x8xf32, #tpu.memory_space<vmem>>, vector<8x8xf32>
    tpu.vector_store %arg6[%c0_11, %c0_12], %14 {strides = array<i32>} : memref<8x8xf32, #tpu.memory_space<vmem>>, vector<8x8xf32>,
    return
  }
  func.func @transform_0(%arg0: i32) -> (i32, i32) {
    %c0_i32 = arith.constant 0 : i32
    %c0_i32_0 = arith.constant 0 : i32
    return %arg0, %c0_i32 : i32, i32
  }
  func.func @transform_1(%arg0: i32) -> (i32, i32) {
    %c0_i32 = arith.constant 0 : i32
    %c0_i32_0 = arith.constant 0 : i32
    %c0_i32_1 = arith.constant 0 : i32
    return %c0_i32, %c0_i32_0 : i32, i32
  }
  func.func @transform_2(%arg0: i32) -> (i32, i32) {
    %c0_i32 = arith.constant 0 : i32
    %c0_i32_0 = arith.constant 0 : i32
    %c0_i32_1 = arith.constant 0 : i32
    return %c0_i32, %c0_i32_0 : i32, i32
  }
  func.func @transform_3(%arg0: i32) -> (i32, i32) {
    %c0_i32 = arith.constant 0 : i32
    %c0_i32_0 = arith.constant 0 : i32
    %c0_i32_1 = arith.constant 0 : i32
    return %c0_i32, %c0_i32_0 : i32, i32
  }
  func.func @transform_4(%arg0: i32) -> (i32, i32) {
    %c0_i32 = arith.constant 0 : i32
    %c0_i32_0 = arith.constant 0 : i32
    %c0_i32_1 = arith.constant 0 : i32
    return %c0_i32, %c0_i32_0 : i32, i32
  }
  func.func @transform_5(%arg0: i32) -> (i32, i32) {
    %c0_i32 = arith.constant 0 : i32
    %c0_i32_0 = arith.constant 0 : i32
    return %arg0, %c0_i32 : i32, i32
  }
}

module attributes {stable_mosaic.version = 11 : i64} {
  func.func @mlp_kernel(%arg0: i32, %arg1: memref<8x16xf32, #tpu.memory_space<vmem>>, %arg2: memref<16x32xbf16, #tpu.memory_space<vmem>>, %arg3: memref<1x32xf32, #tpu.memory_space<vmem>>, %arg4: memref<32x8xbf16, #tpu.memory_space<vmem>>, %arg5: memref<1x8xf32, #tpu.memory_space<vmem>>, %arg6: memref<8x8xf32, #tpu.memory_space<vmem>>) attributes {dimension_semantics = [#tpu.dimension_semantics<parallel>], iteration_bounds = array<i64: 1>, scalar_prefetch = 0 : i64, scratch_operands = 0 : i64, tpu.core_type = #tpu.core_type<tc>, window_params = [{transform_indices = @transform_0, window_bounds = array<i64: 8, 16>}, {pipeline_mode = #tpu.pipeline_mode<synchronous>, transform_indices = @transform_1, window_bounds = array<i64: 16, 32>}, {pipeline_mode = #tpu.pipeline_mode<synchronous>, transform_indices = @transform_2, window_bounds = array<i64: 1, 32>}, {pipeline_mode = #tpu.pipeline_mode<synchronous>, transform_indices = @transform_3, window_bounds = array<i64: 32, 8>}, {pipeline_mode = #tpu.pipeline_mode<synchronous>, transform_indices = @transform_4, window_bounds = array<i64: 1, 8>}, {transform_indices = @transform_5, window_bounds = array<i64: 8, 8>}]} {
    %c0 = arith.constant 0 : index
    %c0_0 = arith.constant 0 : index
    %0 = vector.load %arg1[%c0, %c0_0] : memref<8x16xf32, #tpu.memory_space<vmem>>, vector<8x16xf32>
    %1 = arith.truncf %0 : vector<8x16xf32> to vector<8x16xbf16>
    %c0_1 = arith.constant 0 : index
    %c0_2 = arith.constant 0 : index
    %2 = vector.load %arg2[%c0_1, %c0_2] : memref<16x32xbf16, #tpu.memory_space<vmem>>, vector<16x32xbf16>
    %c0_3 = arith.constant 0 : index
    %c0_4 = arith.constant 0 : index
    %3 = vector.load %arg4[%c0_3, %c0_4] : memref<32x8xbf16, #tpu.memory_space<vmem>>, vector<32x8xbf16>
    %cst = arith.constant dense<0.000000e+00> : vector<8x32xf32>
    %4 = tpu.matmul %1, %2, %cst {dimension_numbers = #tpu.dot_dimension_numbers<[1], [0], [0], [1], [0, 0, 1, 1], [], []>} : vector<8x16xbf16>, vector<16x32xbf16>, vector<8x32xf32> -> vector<8x32xf32>
    %c0_5 = arith.constant 0 : index
    %c0_6 = arith.constant 0 : index
    %5 = vector.load %arg3[%c0_5, %c0_6] : memref<1x32xf32, #tpu.memory_space<vmem>>, vector<1x32xf32>
    %6 = vector.broadcast %5 : vector<1x32xf32> to vector<8x32xf32>
    %7 = arith.addf %4, %6 : vector<8x32xf32>
    %cst_7 = arith.constant 0.000000e+00 : f32
    %8 = vector.broadcast %cst_7 : f32 to vector<8x32xf32>
    %9 = arith.maximumf %7, %8 : vector<8x32xf32>
    %10 = arith.truncf %9 : vector<8x32xf32> to vector<8x32xbf16>
    %cst_8 = arith.constant dense<0.000000e+00> : vector<8x8xf32>
    %11 = tpu.matmul %10, %3, %cst_8 {dimension_numbers = #tpu.dot_dimension_numbers<[1], [0], [0], [1], [0, 0, 1, 1], [], []>} : vector<8x32xbf16>, vector<32x8xbf16>, vector<8x8xf32> -> vector<8x8xf32>
    %c0_9 = arith.constant 0 : index
    %c0_10 = arith.constant 0 : index
    %12 = vector.load %arg5[%c0_9, %c0_10] : memref<1x8xf32, #tpu.memory_space<vmem>>, vector<1x8xf32>
    %13 = vector.broadcast %12 : vector<1x8xf32> to vector<8x8xf32>
    %14 = arith.addf %11, %13 : vector<8x8xf32>
    %c0_11 = arith.constant 0 : index
    %c0_12 = arith.constant 0 : index
    %15 = vector.load %arg6[%c0_11, %c0_12] : memref<8x8xf32, #tpu.memory_space<vmem>>, vector<8x8xf32>
    tpu.vector_store %arg6[%c0_11, %c0_12], %14 {strides = array<i32>} : memref<8x8xf32, #tpu.memory_space<vmem>>, vector<8x8xf32>,
    return
  }
  func.func @transform_0(%arg0: i32) -> (i32, i32) {
    %c0_i32 = arith.constant 0 : i32
    %c0_i32_0 = arith.constant 0 : i32
    return %arg0, %c0_i32 : i32, i32
  }
  func.func @transform_1(%arg0: i32) -> (i32, i32) {
    %c0_i32 = arith.constant 0 : i32
    %c0_i32_0 = arith.constant 0 : i32
    %c0_i32_1 = arith.constant 0 : i32
    return %c0_i32, %c0_i32_0 : i32, i32
  }
  func.func @transform_2(%arg0: i32) -> (i32, i32) {
    %c0_i32 = arith.constant 0 : i32
    %c0_i32_0 = arith.constant 0 : i32
    %c0_i32_1 = arith.constant 0 : i32
    return %c0_i32, %c0_i32_0 : i32, i32
  }
  func.func @transform_3(%arg0: i32) -> (i32, i32) {
    %c0_i32 = arith.constant 0 : i32
    %c0_i32_0 = arith.constant 0 : i32
    %c0_i32_1 = arith.constant 0 : i32
    return %c0_i32, %c0_i32_0 : i32, i32
  }
  func.func @transform_4(%arg0: i32) -> (i32, i32) {
    %c0_i32 = arith.constant 0 : i32
    %c0_i32_0 = arith.constant 0 : i32
    %c0_i32_1 = arith.constant 0 : i32
    return %c0_i32, %c0_i32_0 : i32, i32
  }
  func.func @transform_5(%arg0: i32) -> (i32, i32) {
    %c0_i32 = arith.constant 0 : i32
    %c0_i32_0 = arith.constant 0 : i32
    return %arg0, %c0_i32 : i32, i32
  }
}

</mosaic_0001>

<bundles_post_ra>
// kernel: tpu_custom_call.1
= control target key start
LH: loop header
LB: loop body
LE: loop exit
PB: predicated region body
PF: predicated region fallthrough
CT: control target
= control target key end

     0   :  { %s208_s0 = inlined_call_operand.vmem [shape: f32[8,16], index: 0, kind: input, shape index: {}]   ;;  %s209_s1 = inlined_call_operand.vmem [shape: bf16[16,32], index: 1, kind: input, shape index: {}]   ;;  %s210_s2 = inlined_call_operand.vmem [shape: f32[1,32], index: 2, kind: input, shape index: {}]   ;;  %s211_s3 = inlined_call_operand.vmem [shape: bf16[32,8], index: 3, kind: input, shape index: {}]   ;;  %s212_s4 = inlined_call_operand.vmem [shape: f32[1,8], index: 4, kind: input, shape index: {}]   ;;  %s213_s5 = inlined_call_operand.hbm [shape: f32[8,8], index: 5, kind: output, shape index: {}]  }
   0x1   :  { %v124_v0 = vld [vmem:[%s209_s1] sm:$0xff] }
   0x2   :  { %v22_v1 = vld [vmem:[%s208_s0] sm:$0xff] }
   0x3   :  { %v23_v2 = vpack.c.bf16 %v22_v1, %v22_v1 }
   0x4   :  { %10 = vsyncpa [#allocation3], 0  ;;  %51 = vmatpush.bf16.msra.mxu0 %v124_v0  ;;  %vm40_vm0 = vcmask 130048   ;;  %v126_v3 = vld [vmem:[%s211_s3 + $0x8] sm:$0xff]  ;;  %v125_v4 = vld [vmem:[%s211_s3] sm:$0xff]  ;;  %vm75_vm1 = vcmask 261120  }
   0x5   :  { %85 = vmatpush.bf16.msra.mxu1 %v126_v3  ;;  %v128_v5 = vld [vmem:[%s210_s2] ss:$0 sm:$0xff]  ;;  %s156_s28 = smov [#allocation2]   ;;  %s101_s6 = sshll.u32 %s213_s5, 4  ;;  %vm92_vm2 = vcmask 64512   ;;  %s102_s6 = int_to_ptr.hbm [resolvable:$true] %s101_s6 }
   0x6   :  { %v129_v11 = vld [vmem:[%s212_s4] ss:$0 sm:$0xff]  ;;  %s99_s29 = sshll.u32 %s156_s28, 4  ;;  %s100_s29 = int_to_ptr.vmem [resolvable:$true] %s99_s29 }
   0x7   :  { %114 = vmatmul.msk.bf16.vlgmr.msra.gmra.mxu0 %vm40_vm0, %v23_v2 }
   0x9   :  { %86 = vmatpush.bf16.msra.mxu1 %v125_v4 }
  0x84   :  { %v53_v6 = vpop.f32.mrf.mxu0 }
  0x85   :  { %v54_v7 = vadd.f32 %v128_v5, %v53_v6 }
  0x87   :  { %v57_v8 = vmax.f32 %v54_v7, 0.0 }
  0x89   :  { %v58_v9 = vpack.c.bf16 %v57_v8, %v57_v8 }
  0x8b   :  { %123 = vmatmul.msk.bf16.vlgmr.msra.gmra.mxu1 %vm75_vm1, %v58_v9 }
  0x8c   :  { %v55_v10 = vpop.f32.mrf.mxu0 }
 0x108   :  { %v88_v12 = vpop.f32.mrf.mxu1 }
 0x109   :  { %v89_v13 = vadd.f32 %v129_v11, %v88_v12 }
 0x10b   :  { %93 = vst.msk [vmem:[#allocation2] sm:$0xff] %vm92_vm2, %v89_v13 }
 0x10c   :  { %104 = dma.vmem_to_hbm [thread:$0]  %s100_s29, 128, %s102_s6, [#allocation3]  }
 0x110   :  { %v90_v14 = vpop.f32.mrf.mxu1 }
 0x111   :  { %154 = dma.done.wait [#allocation3], 128  }
 0x112   :  { %155 = vsyncadd [#allocation3], 4294967168 }
 0x113   :  { %109 = vsyncpa [#allocation3], 1 }

// kernel: tpu_custom_call.1
= control target key start
LH: loop header
LB: loop body
LE: loop exit
PB: predicated region body
PF: predicated region fallthrough
CT: control target
= control target key end

     0   :  { %s208_s0 = inlined_call_operand.vmem [shape: f32[8,16], index: 0, kind: input, shape index: {}]   ;;  %s209_s1 = inlined_call_operand.vmem [shape: bf16[16,32], index: 1, kind: input, shape index: {}]   ;;  %s210_s2 = inlined_call_operand.vmem [shape: f32[1,32], index: 2, kind: input, shape index: {}]   ;;  %s211_s3 = inlined_call_operand.vmem [shape: bf16[32,8], index: 3, kind: input, shape index: {}]   ;;  %s212_s4 = inlined_call_operand.vmem [shape: f32[1,8], index: 4, kind: input, shape index: {}]   ;;  %s213_s5 = inlined_call_operand.hbm [shape: f32[8,8], index: 5, kind: output, shape index: {}]  }
   0x1   :  { %v124_v0 = vld [vmem:[%s209_s1] sm:$0xff] }
   0x2   :  { %v22_v1 = vld [vmem:[%s208_s0] sm:$0xff] }
   0x3   :  { %v23_v2 = vpack.c.bf16 %v22_v1, %v22_v1 }
   0x4   :  { %10 = vsyncpa [#allocation3], 0  ;;  %51 = vmatpush.bf16.msra.mxu0 %v124_v0  ;;  %vm40_vm0 = vcmask 130048   ;;  %v126_v3 = vld [vmem:[%s211_s3 + $0x8] sm:$0xff]  ;;  %v125_v4 = vld [vmem:[%s211_s3] sm:$0xff]  ;;  %vm75_vm1 = vcmask 261120  }
   0x5   :  { %85 = vmatpush.bf16.msra.mxu1 %v126_v3  ;;  %v128_v5 = vld [vmem:[%s210_s2] ss:$0 sm:$0xff]  ;;  %s156_s28 = smov [#allocation2]   ;;  %s101_s6 = sshll.u32 %s213_s5, 4  ;;  %vm92_vm2 = vcmask 64512   ;;  %s102_s6 = int_to_ptr.hbm [resolvable:$true] %s101_s6 }
   0x6   :  { %v129_v11 = vld [vmem:[%s212_s4] ss:$0 sm:$0xff]  ;;  %s99_s29 = sshll.u32 %s156_s28, 4  ;;  %s100_s29 = int_to_ptr.vmem [resolvable:$true] %s99_s29 }
   0x7   :  { %114 = vmatmul.msk.bf16.vlgmr.msra.gmra.mxu0 %vm40_vm0, %v23_v2 }
   0x9   :  { %86 = vmatpush.bf16.msra.mxu1 %v125_v4 }
  0x84   :  { %v53_v6 = vpop.f32.mrf.mxu0 }
  0x85   :  { %v54_v7 = vadd.f32 %v128_v5, %v53_v6 }
  0x87   :  { %v57_v8 = vmax.f32 %v54_v7, 0.0 }
  0x89   :  { %v58_v9 = vpack.c.bf16 %v57_v8, %v57_v8 }
  0x8b   :  { %123 = vmatmul.msk.bf16.vlgmr.msra.gmra.mxu1 %vm75_vm1, %v58_v9 }
  0x8c   :  { %v55_v10 = vpop.f32.mrf.mxu0 }
 0x108   :  { %v88_v12 = vpop.f32.mrf.mxu1 }
 0x109   :  { %v89_v13 = vadd.f32 %v129_v11, %v88_v12 }
 0x10b   :  { %93 = vst.msk [vmem:[#allocation2] sm:$0xff] %vm92_vm2, %v89_v13 }
 0x10c   :  { %104 = dma.vmem_to_hbm [thread:$0]  %s100_s29, 128, %s102_s6, [#allocation3]  }
 0x110   :  { %v90_v14 = vpop.f32.mrf.mxu1 }
 0x111   :  { %154 = dma.done.wait [#allocation3], 128  }
 0x112   :  { %155 = vsyncadd [#allocation3], 4294967168 }
 0x113   :  { %109 = vsyncpa [#allocation3], 1 }

</bundles_post_ra>
